<compile_context>
chip_gen: v5e
topology: v5e:2x2
jax: 0.10.0
libtpu: 0.0.40
codegen_flags: <defaults>
</compile_context>

<pallas_src>
import jax
import jax.numpy as jnp
from jax.experimental import pallas as pl
from jax.experimental.pallas import tpu as pltpu


def actor_critic_kernel(
    x_ref,      # (IN, TB)        f32   batch on the lane axis
    w1t_ref,    # (H, IN)         f32   w1.T
    b12t_ref,   # (H, 2)          f32   col 0 = b1, col 1 = b2
    w2t_ref,    # (H, H)          f32   w2.T
    wht_ref,    # (OUT+1, H)      f32   fused [actor | critic] weights, transposed
    bht_ref,    # (OUT+1, 1)      f32   fused [actor | critic] bias
    out_ref,    # (OUT+1, TB)     f32   rows [:OUT] = policy, row [OUT] = value
):
    n_act = out_ref.shape[0] - 1          # OUT (static)

    # ---- feature MLP, everything (H, TB): lane-dense, full-width MXU N ----
    h = jnp.dot(w1t_ref[...], x_ref[...], preferred_element_type=jnp.float32)
    h = jnp.maximum(h + b12t_ref[:, 0:1], 0.0)

    h = jnp.dot(w2t_ref[...], h, preferred_element_type=jnp.float32)
    h = jnp.maximum(h + b12t_ref[:, 1:2], 0.0)

    # ---- fused actor+critic head: one MXU matmul -> (OUT+1, TB) ----
    heads = jnp.dot(wht_ref[...], h, preferred_element_type=jnp.float32)
    heads = heads + bht_ref[...]

    logits = heads[:n_act, :]             # (OUT, TB)
    value = heads[n_act:, :]              # (1,   TB)

    # Numerically stable softmax over the tiny action axis (sublane rows).
    # Exact divide: policy rows sum to 1 (log-prob / ratio math downstream).
    m = jnp.max(logits, axis=0, keepdims=True)
    e = jnp.exp(logits - m)
    policy = e / jnp.sum(e, axis=0, keepdims=True)

    # Single lane-dense writeback per tile.
    out_ref[...] = jnp.concatenate([policy, value], axis=0)


def actor_critic_forward(state, params, *, tb=None):
    """state: (B, input_size) f32. Returns (policy (B, OUT), value (B, 1))."""
    B, IN = state.shape
    H = params["w1"].shape[1]
    OUT = params["wa"].shape[1]
    n_out = OUT + 1

    # Transposed, head-fused parameter layout (tiny; in a real training loop
    # prepare these once outside the step).
    w1t = params["w1"].T                                              # (H, IN)
    w2t = params["w2"].T                                              # (H, H)
    wht = jnp.concatenate([params["wa"], params["wc"]], axis=1).T     # (n_out, H)
    bht = jnp.concatenate([params["ba"], params["bc"]], axis=1).T     # (n_out, 1)
    b12t = jnp.concatenate([params["b1"], params["b2"]], axis=0).T    # (H, 2)

    # Batch on the lane axis.
    # TODO(synk): a production PAAC loop should keep `state` in (IN, B) layout
    # natively so this transpose pass over HBM disappears entirely.
    x_t = state.T                                                     # (IN, B)

    # Batch tile: one full-extent block for small batches; otherwise large
    # lane-aligned tiles with >= 2 grid steps (keeps both v7x TensorCores busy
    # via dimension_semantics=("parallel",)).  VMEM per tile is tiny (< 4 MiB
    # even at tb=4096), so bigger tiles just amortize the ~0.35 us/step cost.
    if tb is None:
        if B <= 1024:
            tb = B
        else:
            tb = min(4096, ((pl.cdiv(B, 2) + 127) // 128) * 128)
    grid = (pl.cdiv(B, tb),)

    const = lambda shape: pl.BlockSpec(shape, lambda i: (0, 0))

    out_t = pl.pallas_call(
        actor_critic_kernel,
        out_shape=jax.ShapeDtypeStruct((n_out, B), jnp.float32),
        grid=grid,
        in_specs=[
            pl.BlockSpec((IN, tb), lambda i: (0, i)),   # x: tiled over batch (lanes)
            const((H, IN)),                             # w1.T  (VMEM-resident)
            const((H, 2)),                              # [b1 | b2]
            const((H, H)),                              # w2.T
            const((n_out, H)),                          # fused head weights
            const((n_out, 1)),                          # fused head bias
        ],
        out_specs=pl.BlockSpec((n_out, tb), lambda i: (0, i)),
        compiler_params=pltpu.CompilerParams(
            dimension_semantics=("parallel",)),         # shard batch across TCs
    )(x_t, w1t, b12t, w2t, wht, bht)

    policy = out_t[:OUT, :].T                           # (B, OUT)
    value = out_t[OUT:, :].T                            # (B, 1)
    return policy, value


def init_params(key, input_size, output_size, hidden=64):
    """Deterministic init mimicking nn.Linear's U(-1/sqrt(fan_in), 1/sqrt(fan_in))."""
    ks = jax.random.split(key, 8)

    def lin(kw, kb, fan_in, fan_out):
        bound = 1.0 / jnp.sqrt(jnp.float32(fan_in))
        w = jax.random.uniform(kw, (fan_in, fan_out), jnp.float32, -bound, bound)
        b = jax.random.uniform(kb, (1, fan_out), jnp.float32, -bound, bound)
        return w, b

    w1, b1 = lin(ks[0], ks[1], input_size, hidden)
    w2, b2 = lin(ks[2], ks[3], hidden, hidden)
    wa, ba = lin(ks[4], ks[5], hidden, output_size)
    wc, bc = lin(ks[6], ks[7], hidden, 1)
    return {"w1": w1, "b1": b1, "w2": w2, "b2": b2,
            "wa": wa, "ba": ba, "wc": wc, "bc": bc}


def reference_forward(state, p):
    """Pure-JAX f32 reference matching the PyTorch module."""
    h = jnp.maximum(jnp.dot(state, p["w1"]) + p["b1"], 0.0)
    h = jnp.maximum(jnp.dot(h, p["w2"]) + p["b2"], 0.0)
    logits = jnp.dot(h, p["wa"]) + p["ba"]
    policy = jax.nn.softmax(logits, axis=-1)
    value = jnp.dot(h, p["wc"]) + p["bc"]
    return policy, value


def _check(policy, value, state, params, output_size):
    batch = state.shape[0]
    assert policy.shape == (batch, output_size)
    assert value.shape == (batch, 1)
    ref_policy, ref_value = reference_forward(state, params)
    assert jnp.allclose(policy, ref_policy, atol=2e-2, rtol=2e-2)
    assert jnp.allclose(value, ref_value, atol=2e-2, rtol=2e-2)
    assert jnp.allclose(jnp.sum(policy, axis=-1), 1.0, atol=1e-5)


if __name__ == "__main__":
    # CartPole-like sizes: state dim 4, 2 discrete actions.
    input_size, output_size, batch = 4, 2, 8

    key = jax.random.PRNGKey(0)
    k_params, k_state, k_big = jax.random.split(key, 3)
    params = init_params(k_params, input_size, output_size)

    # Small-batch (single full-extent block) path.
    state = jax.random.normal(k_state, (batch, input_size), jnp.float32)
    policy, value = actor_critic_forward(state, params)
    policy, value = jax.block_until_ready((policy, value))
    _check(policy, value, state, params, output_size)

    # Multi-tile path with a ragged last tile (exercises grid=pl.cdiv(B, tb)).
    big_batch = 1400
    big_state = jax.random.normal(k_big, (big_batch, input_size), jnp.float32)
    big_policy, big_value = actor_critic_forward(big_state, params)
    big_policy, big_value = jax.block_until_ready((big_policy, big_value))
    _check(big_policy, big_value, big_state, params, output_size)

    print("KERNEL_OK")
</pallas_src>

<mosaic_0001>
module attributes {stable_mosaic.version = 11 : i64} {
  func.func @actor_critic_kernel(%arg0: i32, %arg1: memref<4x8xf32, #tpu.memory_space<vmem>>, %arg2: memref<64x4xf32, #tpu.memory_space<vmem>>, %arg3: memref<64x2xf32, #tpu.memory_space<vmem>>, %arg4: memref<64x64xf32, #tpu.memory_space<vmem>>, %arg5: memref<3x64xf32, #tpu.memory_space<vmem>>, %arg6: memref<3x1xf32, #tpu.memory_space<vmem>>, %arg7: memref<3x8xf32, #tpu.memory_space<vmem>>) attributes {dimension_semantics = [#tpu.dimension_semantics<parallel>], iteration_bounds = array<i64: 1>, scalar_prefetch = 0 : i64, scratch_operands = 0 : i64, tpu.core_type = #tpu.core_type<tc>, window_params = [{transform_indices = @transform_0, window_bounds = array<i64: 4, 8>}, {pipeline_mode = #tpu.pipeline_mode<synchronous>, transform_indices = @transform_1, window_bounds = array<i64: 64, 4>}, {pipeline_mode = #tpu.pipeline_mode<synchronous>, transform_indices = @transform_2, window_bounds = array<i64: 64, 2>}, {pipeline_mode = #tpu.pipeline_mode<synchronous>, transform_indices = @transform_3, window_bounds = array<i64: 64, 64>}, {pipeline_mode = #tpu.pipeline_mode<synchronous>, transform_indices = @transform_4, window_bounds = array<i64: 3, 64>}, {pipeline_mode = #tpu.pipeline_mode<synchronous>, transform_indices = @transform_5, window_bounds = array<i64: 3, 1>}, {transform_indices = @transform_6, window_bounds = array<i64: 3, 8>}]} {
    %c0 = arith.constant 0 : index
    %c0_0 = arith.constant 0 : index
    %0 = vector.load %arg2[%c0, %c0_0] : memref<64x4xf32, #tpu.memory_space<vmem>>, vector<64x4xf32>
    %c0_1 = arith.constant 0 : index
    %c0_2 = arith.constant 0 : index
    %1 = vector.load %arg1[%c0_1, %c0_2] : memref<4x8xf32, #tpu.memory_space<vmem>>, vector<4x8xf32>
    %cst = arith.constant dense<0.000000e+00> : vector<64x8xf32>
    %2 = tpu.matmul %0, %1, %cst {dimension_numbers = #tpu.dot_dimension_numbers<[1], [0], [0], [1], [0, 0, 1, 1], [], []>} : vector<64x4xf32>, vector<4x8xf32>, vector<64x8xf32> -> vector<64x8xf32>
    %c0_3 = arith.constant 0 : index
    %c0_4 = arith.constant 0 : index
    %3 = vector.load %arg3[%c0_3, %c0_4] : memref<64x2xf32, #tpu.memory_space<vmem>>, vector<64x1xf32>
    %4 = vector.broadcast %3 : vector<64x1xf32> to vector<64x8xf32>
    %5 = arith.addf %2, %4 : vector<64x8xf32>
    %cst_5 = arith.constant 0.000000e+00 : f32
    %6 = vector.broadcast %cst_5 : f32 to vector<64x8xf32>
    %7 = arith.maximumf %5, %6 : vector<64x8xf32>
    %c0_6 = arith.constant 0 : index
    %c0_7 = arith.constant 0 : index
    %8 = vector.load %arg4[%c0_6, %c0_7] : memref<64x64xf32, #tpu.memory_space<vmem>>, vector<64x64xf32>
    %cst_8 = arith.constant dense<0.000000e+00> : vector<64x8xf32>
    %9 = tpu.matmul %8, %7, %cst_8 {dimension_numbers = #tpu.dot_dimension_numbers<[1], [0], [0], [1], [0, 0, 1, 1], [], []>} : vector<64x64xf32>, vector<64x8xf32>, vector<64x8xf32> -> vector<64x8xf32>
    %c0_9 = arith.constant 0 : index
    %c1 = arith.constant 1 : index
    %10 = vector.load %arg3[%c0_9, %c1] : memref<64x2xf32, #tpu.memory_space<vmem>>, vector<64x1xf32>
    %11 = vector.broadcast %10 : vector<64x1xf32> to vector<64x8xf32>
    %12 = arith.addf %9, %11 : vector<64x8xf32>
    %cst_10 = arith.constant 0.000000e+00 : f32
    %13 = vector.broadcast %cst_10 : f32 to vector<64x8xf32>
    %14 = arith.maximumf %12, %13 : vector<64x8xf32>
    %c0_11 = arith.constant 0 : index
    %c0_12 = arith.constant 0 : index
    %15 = vector.load %arg5[%c0_11, %c0_12] : memref<3x64xf32, #tpu.memory_space<vmem>>, vector<3x64xf32>
    %cst_13 = arith.constant dense<0.000000e+00> : vector<3x8xf32>
    %16 = tpu.matmul %15, %14, %cst_13 {dimension_numbers = #tpu.dot_dimension_numbers<[1], [0], [0], [1], [0, 0, 1, 1], [], []>} : vector<3x64xf32>, vector<64x8xf32>, vector<3x8xf32> -> vector<3x8xf32>
    %c0_14 = arith.constant 0 : index
    %c0_15 = arith.constant 0 : index
    %17 = vector.load %arg6[%c0_14, %c0_15] : memref<3x1xf32, #tpu.memory_space<vmem>>, vector<3x1xf32>
    %18 = vector.broadcast %17 : vector<3x1xf32> to vector<3x8xf32>
    %19 = arith.addf %16, %18 : vector<3x8xf32>
    %20 = vector.extract_strided_slice %19 {offsets = [0, 0], sizes = [2, 8], strides = [1, 1]} : vector<3x8xf32> to vector<2x8xf32>
    %21 = vector.extract_strided_slice %19 {offsets = [2, 0], sizes = [1, 8], strides = [1, 1]} : vector<3x8xf32> to vector<1x8xf32>
    %cst_16 = arith.constant dense<0xFF800000> : vector<8xf32>
    %22 = vector.multi_reduction <maximumf>, %20, %cst_16 [0] : vector<2x8xf32> to vector<8xf32>
    %23 = vector.shape_cast %22 : vector<8xf32> to vector<1x8xf32>
    %24 = vector.broadcast %23 : vector<1x8xf32> to vector<2x8xf32>
    %25 = arith.subf %20, %24 : vector<2x8xf32>
    %26 = math.exp %25 : vector<2x8xf32>
    %cst_17 = arith.constant dense<0.000000e+00> : vector<8xf32>
    %27 = vector.multi_reduction <add>, %26, %cst_17 [0] : vector<2x8xf32> to vector<8xf32>
    %28 = vector.shape_cast %27 : vector<8xf32> to vector<1x8xf32>
    %29 = vector.broadcast %28 : vector<1x8xf32> to vector<2x8xf32>
    %30 = arith.divf %26, %29 : vector<2x8xf32>
    %31 = tpu.concatenate %30, %21 in 0 : vector<2x8xf32>, vector<1x8xf32> -> vector<3x8xf32>
    %c0_18 = arith.constant 0 : index
    %c0_19 = arith.constant 0 : index
    %32 = vector.load %arg7[%c0_18, %c0_19] : memref<3x8xf32, #tpu.memory_space<vmem>>, vector<3x8xf32>
    tpu.vector_store %arg7[%c0_18, %c0_19], %31 {strides = array<i32>} : memref<3x8xf32, #tpu.memory_space<vmem>>, vector<3x8xf32>,
    return
  }
  func.func @transform_0(%arg0: i32) -> (i32, i32) {
    %c0_i32 = arith.constant 0 : i32
    %c0_i32_0 = arith.constant 0 : i32
    return %c0_i32, %arg0 : i32, i32
  }
  func.func @transform_1(%arg0: i32) -> (i32, i32) {
    %c0_i32 = arith.constant 0 : i32
    %c0_i32_0 = arith.constant 0 : i32
    %c0_i32_1 = arith.constant 0 : i32
    return %c0_i32, %c0_i32_0 : i32, i32
  }
  func.func @transform_2(%arg0: i32) -> (i32, i32) {
    %c0_i32 = arith.constant 0 : i32
    %c0_i32_0 = arith.constant 0 : i32
    %c0_i32_1 = arith.constant 0 : i32
    return %c0_i32, %c0_i32_0 : i32, i32
  }
  func.func @transform_3(%arg0: i32) -> (i32, i32) {
    %c0_i32 = arith.constant 0 : i32
    %c0_i32_0 = arith.constant 0 : i32
    %c0_i32_1 = arith.constant 0 : i32
    return %c0_i32, %c0_i32_0 : i32, i32
  }
  func.func @transform_4(%arg0: i32) -> (i32, i32) {
    %c0_i32 = arith.constant 0 : i32
    %c0_i32_0 = arith.constant 0 : i32
    %c0_i32_1 = arith.constant 0 : i32
    return %c0_i32, %c0_i32_0 : i32, i32
  }
  func.func @transform_5(%arg0: i32) -> (i32, i32) {
    %c0_i32 = arith.constant 0 : i32
    %c0_i32_0 = arith.constant 0 : i32
    %c0_i32_1 = arith.constant 0 : i32
    return %c0_i32, %c0_i32_0 : i32, i32
  }
  func.func @transform_6(%arg0: i32) -> (i32, i32) {
    %c0_i32 = arith.constant 0 : i32
    %c0_i32_0 = arith.constant 0 : i32
    return %c0_i32, %arg0 : i32, i32
  }
}

</mosaic_0001>

<bundles_post_ra>
// kernel: tpu_custom_call.1
= control target key start
LH: loop header
LB: loop body
LE: loop exit
PB: predicated region body
PF: predicated region fallthrough
CT: control target
= control target key end

     0   :  { %vm106_vm0 = vcmask 1043456   ;;  %v424_v3 = vmov 0   ;;  %vm81_vm1 = vcmask 31744   ;;  %s568_s0 = inlined_call_operand.vmem [shape: f32[4,8], index: 0, kind: input, shape index: {}]   ;;  %s569_s1 = inlined_call_operand.vmem [shape: f32[64,4], index: 1, kind: input, shape index: {}]   ;;  %s570_s2 = inlined_call_operand.vmem [shape: f32[64,2], index: 2, kind: input, shape index: {}]   ;;  %s571_s3 = inlined_call_operand.vmem [shape: f32[64,64], index: 3, kind: input, shape index: {}]   ;;  %s572_s4 = inlined_call_operand.vmem [shape: f32[3,64], index: 4, kind: input, shape index: {}]   ;;  %s573_s5 = inlined_call_operand.vmem [shape: f32[3,1], index: 5, kind: input, shape index: {}]   ;;  %s574_s6 = inlined_call_operand.hbm [shape: f32[3,8], index: 6, kind: output, shape index: {}]  }
   0x1   :  { %v32_v0 = vld [vmem:[%s568_s0] sm:$0xf]  ;;  %v38_v1 = vld [vmem:[%s570_s2 + $0x28] sm:$0xff]  ;;  %387 = vset.pattern.permute.xlu1 %v424_v3  ;;  %v40_v4 = vld [vmem:[%s570_s2 + $0x38] sm:$0xff]  ;;  %386 = vset.pattern.permute.xlu0 %v424_v3 }
   0x2   :  { %v24_v2 = vld [vmem:[%s569_s1] sm:$0xff]  ;;  %356 = vmatpush.msk.msra.mxu0 %vm106_vm0, %v32_v0  ;;  %68 = vperm.xlu1 %387, %v38_v1   ;;  %v30_v5 = vld [vmem:[%s569_s1 + $0x30] sm:$0xff] }
   0x3   :  { %357 = vmatmul.msk.f32.vlgmr.msra.gmra.mxu0 %vm81_vm1, %v24_v2  ;;  %374 = vmatpush.msk.msra.mxu2 %vm106_vm0, %v32_v0 }
   0x4   :  { %78 = vperm.xlu0 %386, %v40_v4   ;;  %363 = vmatmul.msk.f32.vlgmr.msra.gmra.mxu2 %vm81_vm1, %v30_v5 }
   0x5   :  { %388 = vset.pattern.permute.xlu2 %v424_v3 }
   0x6   :  { %11 = vsyncpa [#allocation3], 0  ;;  %v37_v6 = vld [vmem:[%s570_s2 + $0x20] sm:$0xff]  ;;  %v25_v7 = vld [vmem:[%s569_s1 + $0x8] sm:$0xff]  ;;  %v425_v30 = vmov 1   ;;  %vm199_vm2 = vcmask 523264  }
   0x7   :  { %v39_v8 = vld [vmem:[%s570_s2 + $0x30] sm:$0xff]  ;;  %v31_v9 = vld [vmem:[%s569_s1 + $0x38] sm:$0xff]  ;;  %v33_v11 = vld [vmem:[%s570_s2] sm:$0xff]  ;;  %vm303_vm3 = vcmask 58368   ;;  %s347_s24 = sshll.u32 %s574_s6, 4  ;;  %vm336_vm8 = vcmask 1041408   ;;  %s348_s24 = int_to_ptr.hbm [resolvable:$true] %s347_s24 }
   0x8   :  { %v36_v10 = vld [vmem:[%s570_s2 + $0x18] sm:$0xff]  ;;  %v26_v12 = vld [vmem:[%s569_s1 + $0x10] sm:$0xff]  ;;  %v34_v14 = vld [vmem:[%s570_s2 + $0x8] sm:$0xff]  ;;  %vm338_vm9 = vcmask 59392  }
   0x9   :  { %58 = vperm.xlu2 %388, %v36_v10   ;;  %v35_v13 = vld [vmem:[%s570_s2 + $0x10] sm:$0xff]  ;;  %v27_v15 = vld [vmem:[%s569_s1 + $0x18] sm:$0xff]  ;;  %v28_v16 = vld [vmem:[%s569_s1 + $0x20] sm:$0xff] }
   0xa   :  { %63 = vperm.xlu1 %387, %v37_v6   ;;  %v29_v17 = vld [vmem:[%s569_s1 + $0x28] sm:$0xff]  ;;  %v163_v51 = vld [vmem:[%s571_s3 + $0x20] sm:$0xff]  ;;  %v165_v55 = vld [vmem:[%s571_s3 + $0x30] sm:$0xff] }
   0xb   :  { %358 = vmatmul.msk.f32.gmra.mxu0 %vm81_vm1, %v25_v7  ;;  %v159_v52 = vld [vmem:[%s571_s3] sm:$0xff]  ;;  %v164_v53 = vld [vmem:[%s571_s3 + $0x28] sm:$0xff]  ;;  %v161_v56 = vld [vmem:[%s571_s3 + $0x10] sm:$0xff] }
   0xc   :  { %73 = vperm.xlu0 %386, %v39_v8   ;;  %364 = vmatmul.msk.f32.gmra.mxu2 %vm81_vm1, %v31_v9  ;;  %v160_v54 = vld [vmem:[%s571_s3 + $0x8] sm:$0xff]  ;;  %v166_v57 = vld [vmem:[%s571_s3 + $0x38] sm:$0xff]  ;;  %v274_v0 = vld [vmem:[%s573_s5] sm:$0x7] }
   0xd   :  { %v162_v58 = vld [vmem:[%s571_s3 + $0x18] sm:$0xff] }
  0x11   :  { %53 = vperm.xlu2 %388, %v35_v13  }
  0x12   :  { %43 = vperm.xlu1 %387, %v33_v11  }
  0x13   :  { %359 = vmatmul.msk.f32.gmra.mxu0 %vm81_vm1, %v26_v12 }
  0x14   :  { %48 = vperm.xlu0 %386, %v34_v14  }
  0x19   :  { %389 = vset.pattern.permute.xlu2 %v425_v30 }
  0x1a   :  { %391 = vset.pattern.permute.xlu1 %v425_v30  ;;  %196 = vperm.xlu2 %389, %v40_v4  }
  0x1b   :  { %360 = vmatmul.msk.f32.gmra.mxu0 %vm81_vm1, %v27_v15  ;;  %188 = vperm.xlu1 %391, %v38_v1  }
  0x1c   :  { %390 = vset.pattern.permute.xlu0 %v425_v30 }
  0x1d   :  { %192 = vperm.xlu0 %390, %v39_v8  }
  0x22   :  { %184 = vperm.xlu2 %389, %v37_v6  }
  0x23   :  { %361 = vmatmul.msk.f32.gmra.mxu0 %vm81_vm1, %v28_v16  ;;  %180 = vperm.xlu1 %391, %v36_v10  }
  0x25   :  { %172 = vperm.xlu0 %390, %v34_v14  }
  0x2a   :  { %176 = vperm.xlu2 %389, %v35_v13  }
  0x2b   :  { %362 = vmatmul.msk.f32.gmra.mxu0 %vm81_vm1, %v29_v17  ;;  %168 = vperm.xlu1 %391, %v33_v11  }
  0x2d   :  { %393 = vset.pattern.permute.xlu0 %v424_v3 }
  0x32   :  { %392 = vset.pattern.permute.xlu2 %v424_v3 }
  0x33   :  { %277 = vperm.xlu2 %392, %v274_v0  }
  0x63   :  { %v59_v32 = vpop.permute.xlu2 %58 }
  0x6b   :  { %v54_v38 = vpop.permute.xlu2 %53 }
  0x74   :  { %v69_v31 = vpop.permute.xlu1 %68  ;;  %v197_v63 = vpop.permute.xlu2 %196 }
  0x76   :  { %v79_v19 = vpop.permute.xlu0 %78 }
  0x7c   :  { %v64_v34 = vpop.permute.xlu1 %63  ;;  %v185_v4 = vpop.permute.xlu2 %184 }
  0x7e   :  { %v74_v22 = vpop.permute.xlu0 %73 }
  0x80   :  { %v127_v18 = vpop.f32.mrf.mxu0 }
  0x84   :  { %v44_v44 = vpop.permute.xlu1 %43  ;;  %v177_v15 = vpop.permute.xlu2 %176 }
  0x85   :  { %v128_v47 = vadd.f32 %v127_v18, %v44_v44 }
  0x86   :  { %v49_v41 = vpop.permute.xlu0 %48 }
  0x87   :  { %v145_v21 = vpop.f32.mrf.mxu2  ;;  %v151_v50 = vmax.f32 %v128_v47, 0.0 }
  0x88   :  { %v130_v20 = vpop.f32.mrf.mxu0  ;;  %v146_v23 = vadd.f32 %v145_v21, %v74_v22 }
  0x89   :  { %v131_v45 = vadd.f32 %v130_v20, %v49_v41 }
  0x8a   :  { %v157_v27 = vmax.f32 %v146_v23, 0.0 }
  0x8b   :  { %v152_v49 = vmax.f32 %v131_v45, 0.0 }
  0x8d   :  { %v189_v1 = vpop.permute.xlu1 %188 }
  0x8f   :  { %v148_v25 = vpop.f32.mrf.mxu2  ;;  %v193_v5 = vpop.permute.xlu0 %192 }
  0x90   :  { %v133_v24 = vpop.f32.mrf.mxu0  ;;  %v149_v26 = vadd.f32 %v148_v25, %v79_v19 }
  0x91   :  { %v134_v42 = vadd.f32 %v133_v24, %v54_v38 }
  0x92   :  { %v158_v28 = vmax.f32 %v149_v26, 0.0 }
  0x93   :  { %v153_v48 = vmax.f32 %v134_v42, 0.0 }
  0x94   :  { %232 = vmatpush.msra.mxu1 %v158_v28  ;;  %375 = vmatpush.msra.mxu3 %v158_v28  ;;  %v273_v28 = vld [vmem:[%s572_s4] sm:$0x7]  ;;  %s426_s4 = smov [#allocation2]  }
  0x95   :  { %v181_v6 = vpop.permute.xlu1 %180  ;;  %s345_s21 = sshll.u32 %s426_s4, 4  ;;  %s346_s21 = int_to_ptr.vmem [resolvable:$true] %s345_s21 }
  0x96   :  { %233 = vmatpush.msra.mxu1 %v157_v27  ;;  %376 = vmatpush.msra.mxu3 %v157_v27 }
  0x97   :  { %v173_v18 = vpop.permute.xlu0 %172 }
  0x98   :  { %v136_v29 = vpop.f32.mrf.mxu0 }
  0x99   :  { %v137_v39 = vadd.f32 %v136_v29, %v59_v32  ;;  %v278_v29 = vpop.permute.xlu2 %277 }
  0x9b   :  { %v154_v46 = vmax.f32 %v137_v39, 0.0 }
  0x9d   :  { %v169_v21 = vpop.permute.xlu1 %168 }
  0xa0   :  { %v139_v33 = vpop.f32.mrf.mxu0 }
  0xa1   :  { %v140_v36 = vadd.f32 %v139_v33, %v64_v34 }
  0xa3   :  { %v155_v43 = vmax.f32 %v140_v36, 0.0 }
  0xa8   :  { %v142_v35 = vpop.f32.mrf.mxu0 }
  0xa9   :  { %v143_v37 = vadd.f32 %v142_v35, %v69_v31 }
  0xab   :  { %v156_v40 = vmax.f32 %v143_v37, 0.0 }
  0xad   :  { %234 = vmatpush.msra.mxu1 %v156_v40  ;;  %377 = vmatpush.msra.mxu3 %v156_v40 }
  0xaf   :  { %235 = vmatpush.msra.mxu1 %v155_v43  ;;  %378 = vmatpush.msra.mxu3 %v155_v43 }
  0xb1   :  { %236 = vmatpush.msra.mxu1 %v154_v46  ;;  %379 = vmatpush.msra.mxu3 %v154_v46 }
  0xb3   :  { %237 = vmatpush.msra.mxu1 %v153_v48  ;;  %380 = vmatpush.msra.mxu3 %v153_v48 }
  0xb5   :  { %238 = vmatpush.msra.mxu1 %v152_v49  ;;  %381 = vmatpush.msra.mxu3 %v152_v49 }
  0xb7   :  { %239 = vmatpush.msra.mxu1 %v151_v50  ;;  %382 = vmatpush.msra.mxu3 %v151_v50 }
  0xb8   :  { %369 = vmatmul.msk.f32.vlgmr.msra.gmra.mxu3 %vm199_vm2, %v163_v51  ;;  %365 = vmatmul.msk.f32.vlgmr.msra.gmra.mxu1 %vm199_vm2, %v159_v52 }
  0xc0   :  { %370 = vmatmul.msk.f32.gmra.mxu3 %vm199_vm2, %v164_v53  ;;  %366 = vmatmul.msk.f32.gmra.mxu1 %vm199_vm2, %v160_v54 }
  0xc8   :  { %371 = vmatmul.msk.f32.gmra.mxu3 %vm199_vm2, %v165_v55  ;;  %367 = vmatmul.msk.f32.gmra.mxu1 %vm199_vm2, %v161_v56 }
  0xd0   :  { %372 = vmatmul.msk.f32.gmra.mxu3 %vm199_vm2, %v166_v57  ;;  %368 = vmatmul.msk.f32.gmra.mxu1 %vm199_vm2, %v162_v58 }
 0x135   :  { %v241_v59 = vpop.f32.mrf.mxu1 }
 0x136   :  { %v242_v24 = vadd.f32 %v241_v59, %v169_v21 }
 0x138   :  { %v265_v27 = vmax.f32 %v242_v24, 0.0 }
 0x13b   :  { %v253_v60 = vpop.f32.mrf.mxu3 }
 0x13c   :  { %v254_v13 = vadd.f32 %v253_v60, %v185_v4 }
 0x13d   :  { %v244_v61 = vpop.f32.mrf.mxu1 }
 0x13e   :  { %v269_v19 = vmax.f32 %v254_v13, 0.0  ;;  %v245_v22 = vadd.f32 %v244_v61, %v173_v18 }
 0x140   :  { %v266_v26 = vmax.f32 %v245_v22, 0.0 }
 0x143   :  { %v256_v62 = vpop.f32.mrf.mxu3 }
 0x144   :  { %v257_v10 = vadd.f32 %v256_v62, %v189_v1 }
 0x145   :  { %v247_v3 = vpop.f32.mrf.mxu1 }
 0x146   :  { %v270_v16 = vmax.f32 %v257_v10, 0.0  ;;  %v248_v20 = vadd.f32 %v247_v3, %v177_v15 }
 0x148   :  { %v267_v25 = vmax.f32 %v248_v20, 0.0 }
 0x14b   :  { %v259_v2 = vpop.f32.mrf.mxu3 }
 0x14c   :  { %v260_v8 = vadd.f32 %v259_v2, %v193_v5 }
 0x14d   :  { %v250_v12 = vpop.f32.mrf.mxu1 }
 0x14e   :  { %v271_v14 = vmax.f32 %v260_v8, 0.0  ;;  %v251_v17 = vadd.f32 %v250_v12, %v181_v6 }
 0x150   :  { %v268_v23 = vmax.f32 %v251_v17, 0.0 }
 0x153   :  { %v262_v7 = vpop.f32.mrf.mxu3 }
 0x154   :  { %v263_v9 = vadd.f32 %v262_v7, %v197_v63 }
 0x156   :  { %v272_v11 = vmax.f32 %v263_v9, 0.0 }
 0x158   :  { %291 = vmatpush.msrb.mxu2 %v272_v11 }
 0x15a   :  { %292 = vmatpush.msrb.mxu2 %v271_v14 }
 0x15c   :  { %293 = vmatpush.msrb.mxu2 %v270_v16 }
 0x15e   :  { %294 = vmatpush.msrb.mxu2 %v269_v19 }
 0x160   :  { %295 = vmatpush.msrb.mxu2 %v268_v23 }
 0x162   :  { %296 = vmatpush.msrb.mxu2 %v267_v25 }
 0x164   :  { %297 = vmatpush.msrb.mxu2 %v266_v26 }
 0x166   :  { %298 = vmatpush.msrb.mxu2 %v265_v27 }
 0x167   :  { %373 = vmatmul.msk.f32.vlgmr.msrb.gmra.mxu2 %vm199_vm2, %v273_v28 }
 0x1ea   :  { %v300_v30 = vpop.f32.mrf.mxu2 }
 0x1eb   :  { %v301_v31 = vadd.f32 %v300_v30, %v278_v29 }
 0x1ed   :  { %v304_v32 = vsel %vm303_vm3, %v301_v31, -inf }
 0x1ee   :  { %v305_v33 = vrot.slane %v304_v32, 4 }
 0x1f0   :  { %v306_v34 = vmax.f32 %v304_v32, %v305_v33 }
 0x1f2   :  { %v307_v35 = vrot.slane %v306_v34, 2 }
 0x1f4   :  { %v308_v36 = vmax.f32 %v306_v34, %v307_v35 }
 0x1f6   :  { %v309_v37 = vrot.slane %v308_v36, 1 }
 0x1f8   :  { %v310_v38 = vmax.f32 %v308_v36, %v309_v37 }
 0x1fa   :  { %v311_v39 = vsub.f32 %v301_v31, %v310_v38 }
 0x1fc   :  { %v312_v40 = vmul.f32 1.442695, %v311_v39 }
 0x1fe   :  { %394 = vpow2.f32 %v312_v40 }
 0x204   :  { %v395_v41 = vpop.eup %394 }
 0x205   :  { %v314_v42 = vsel %vm303_vm3, %v395_v41, 0.0 }
 0x206   :  { %v315_v43 = vrot.slane %v314_v42, 4 }
 0x208   :  { %v316_v44 = vadd.f32 %v315_v43, %v314_v42 }
 0x20a   :  { %v317_v45 = vrot.slane %v316_v44, 2 }
 0x20c   :  { %v318_v46 = vadd.f32 %v317_v45, %v316_v44 }
 0x20e   :  { %v319_v47 = vrot.slane %v318_v46, 1 }
 0x210   :  { %v320_v48 = vadd.f32 %v319_v47, %v318_v46 }
 0x212   :  { %396 = vrcp.f32 %v320_v48  ;;  %v332_v52 = vand.u32 2147483648, %v320_v48  ;;  %v330_v54 = vand.u32 2147483647, %v320_v48  ;;  %vm326_vm5 = vweird.f32 %v320_v48 }
 0x214   :  { %v333_v56 = vor.u32 1.1754944e-38, %v332_v52  ;;  %vm331_vm7 = vcmp.eq.f32.partialorder %v330_v54, 8.507059e+37 }
 0x218   :  { %v397_v49 = vpop.eup %396 }
 0x219   :  { %v322_v50 = vmul.f32 %v397_v49, %v320_v48  ;;  %vm327_vm4 = vweird.f32 %v397_v49 }
 0x21a   :  { %vm328_vm6 = vmor %vm326_vm5, %vm327_vm4 }
 0x21b   :  { %v323_v51 = vsub.f32 1.0, %v322_v50 }
 0x21d   :  { %v324_v53 = vmul.f32 %v397_v49, %v323_v51 }
 0x21f   :  { %v325_v55 = vadd.f32 %v397_v49, %v324_v53 }
 0x221   :  { %v329_v57 = vsel %vm328_vm6, %v397_v49, %v325_v55 }
 0x222   :  { %v334_v58 = vsel %vm331_vm7, %v333_v56, %v329_v57 }
 0x223   :  { %v335_v59 = vmul.f32 %v395_v41, %v334_v58 }
 0x225   :  { %v337_v60 = vsel %vm336_vm8, %v335_v59, %v301_v31 }
 0x226   :  { %339 = vst.msk [vmem:[#allocation2] sm:$0x7] %vm338_vm9, %v337_v60 }
 0x227   :  { %350 = dma.vmem_to_hbm [thread:$0]  %s346_s21, 64, %s348_s24, [#allocation3]  }
 0x228   :  { %422 = dma.done.wait [#allocation3], 64  }
 0x229   :  { %423 = vsyncadd [#allocation3], 4294967232 }
 0x22a   :  { %355 = vsyncpa [#allocation3], 1 }

</bundles_post_ra>
